<compile_context>
chip_gen: v7x
topology: tpu7x:2x2x1
jax: 0.10.0
libtpu: 0.0.40
codegen_flags: <defaults>
</compile_context>

<pallas_src>
import functools

import jax
import jax.numpy as jnp
from jax.experimental import pallas as pl
from jax.experimental.pallas import tpu as pltpu

EPS = 1e-5  # BatchNorm1d default eps


def _rup(v, m):
    return ((v + m - 1) // m) * m


# ----------------------------------------------------------------------------
# Fused kernel: one grid step = Bn batch elements, whole network.
# ----------------------------------------------------------------------------
def _make_tcn_kernel(cfgs, K, T, Cp, c_out, Bn, g0, gap):
    """cfgs: tuple of (dilation, pad, has_downsample) per layer (static)."""
    n_params = sum(4 + (2 if has_ds else 0) for (_, _, has_ds) in cfgs)
    seg = T + gap                      # per-batch-element lane segment stride
    W = Bn * T + (Bn - 1) * gap        # activation / accumulator slab width
    need_mask = (Bn > 1) and (gap > 0)

    def kernel(*refs):
        x_ref = refs[0]
        p = refs[1:1 + n_params]
        o_ref = refs[1 + n_params]
        pad_buf = refs[2 + n_params]   # (Cp, g0 + Bn*seg) f32 zero-halo buffer

        # Zero only the halo / gap strips (interiors are rewritten below; the
        # inter-segment gaps are re-zeroed by every masked write-back).
        if g0 > 0:
            pad_buf[:, 0:g0] = jnp.zeros((Cp, g0), jnp.float32)
        if gap > 0:
            for b in range(Bn):
                s = g0 + b * seg + T
                pad_buf[:, s:s + gap] = jnp.zeros((Cp, gap), jnp.float32)

        # Place the Bn input slices into their lane segments.
        for b in range(Bn):
            s = g0 + b * seg
            pad_buf[:, s:s + T] = x_ref[b].astype(jnp.float32)

        if need_mask:
            col = jax.lax.broadcasted_iota(jnp.int32, (1, W), 1)
            interior = (col % seg) < T           # False on the gap columns
        else:
            interior = None

        def masked(v):
            return jnp.where(interior, v, 0.0) if need_mask else v

        def conv(w_ref, b_ref, d, pad):
            # Centered dilated conv == Conv1d(pad=(K-1)*d) + symmetric Chomp1d.
            acc = None
            for k in range(K):                   # K accumulated MXU matmuls
                s = g0 - pad + k * d
                slab = pad_buf[:, s:s + W].astype(jnp.bfloat16)
                y = jnp.dot(w_ref[k], slab, preferred_element_type=jnp.float32)
                acc = y if acc is None else acc + y
            return acc + b_ref[...]              # (Cp, 1) bias, bcast on lanes

        i = 0
        n_layers = len(cfgs)
        for li, (d, pad, has_ds) in enumerate(cfgs):
            w1, b1, w2, b2 = p[i], p[i + 1], p[i + 2], p[i + 3]
            i += 4
            # Residual path: read the pre-layer activation before overwriting.
            if has_ds:                           # 1x1 downsample conv
                wd, bd = p[i], p[i + 1]
                i += 2
                xb = pad_buf[:, g0:g0 + W].astype(jnp.bfloat16)
                res = jnp.dot(wd[...], xb, preferred_element_type=jnp.float32)
                res = res + bd[...]
            else:
                res = pad_buf[:, g0:g0 + W]      # f32 identity residual

            h = masked(jnp.maximum(conv(w1, b1, d, pad), 0.0))  # conv1+BN+ReLU
            pad_buf[:, g0:g0 + W] = h                           # RHS of conv2
            out = jnp.maximum(conv(w2, b2, d, pad), 0.0)        # conv2+BN+ReLU
            y = jnp.maximum(out + res, 0.0)                     # relu(out+res)

            if li < n_layers - 1:
                pad_buf[:, g0:g0 + W] = masked(y)
            else:
                for b in range(Bn):              # only real channels go to HBM
                    o_ref[b] = y[:c_out, b * seg:b * seg + T].astype(o_ref.dtype)

    return kernel


# ----------------------------------------------------------------------------
# Wrapper: BN folding, channel padding, bf16 weights, single pallas_call.
# ----------------------------------------------------------------------------
def _pad_to(a, shape):
    return jnp.pad(a, [(0, s - d) for d, s in zip(a.shape, shape)])


def _fold_bn(w, b, gamma, beta, mean, var):
    """Fold eval-mode BatchNorm1d into the conv weight / bias (f32)."""
    scale = gamma * jax.lax.rsqrt(var + EPS)              # (Cout,)
    return w * scale[:, None, None], (b - mean) * scale + beta


def _prepare(params, K, Cp):
    """Fold BN, pad channels to Cp, split weights into K (Cp, Cp) taps (bf16)."""
    cfgs, flat = [], []

    def taps(w):                                          # (Cout,Cin,K)->(K,Cp,Cp)
        w = _pad_to(w, (Cp, Cp, K))
        return jnp.transpose(w, (2, 0, 1)).astype(jnp.bfloat16)

    def vec(b):                                           # (Cout,) -> (Cp,1) f32
        return _pad_to(b, (Cp,)).reshape(Cp, 1).astype(jnp.float32)

    for p in params:
        d = p["dilation"]
        chomp = (K - 1) * d
        assert chomp % 2 == 0, "chomp size must be even for symmetric chomp"
        pad = chomp // 2
        w1, b1 = _fold_bn(p["w1"], p["b1"], p["bn1_g"], p["bn1_b"],
                          p["bn1_m"], p["bn1_v"])
        w2, b2 = _fold_bn(p["w2"], p["b2"], p["bn2_g"], p["bn2_b"],
                          p["bn2_m"], p["bn2_v"])
        has_ds = p["wd"] is not None
        flat += [taps(w1), vec(b1), taps(w2), vec(b2)]
        if has_ds:
            flat += [_pad_to(p["wd"], (Cp, Cp)).astype(jnp.bfloat16),
                     vec(p["bd"])]
        cfgs.append((d, pad, has_ds))
    return tuple(cfgs), tuple(flat)


@functools.partial(jax.jit,
                   static_argnames=("cfgs", "K", "Cp", "c_out", "Bn", "g0", "gap"))
def _tcn_forward(x_nct, flat, *, cfgs, K, Cp, c_out, Bn, g0, gap):
    N, _, T = x_nct.shape
    xp = _pad_to(x_nct, (N, Cp, T))              # one-time zero channel pad
    seg = T + gap
    w_buf = g0 + Bn * seg

    def const_spec(a):
        r = a.ndim
        return pl.BlockSpec(a.shape, lambda n, _r=r: (0,) * _r)

    in_specs = [pl.BlockSpec((Bn, Cp, T), lambda n: (n, 0, 0))]
    in_specs += [const_spec(a) for a in flat]

    # Explicit VMEM budget: double-buffered operands + persistent scratch.
    op_bytes = sum(int(a.size) * a.dtype.itemsize for a in flat)
    blk_bytes = Bn * Cp * T * 4 + Bn * c_out * T * x_nct.dtype.itemsize
    vmem_est = 2 * (op_bytes + blk_bytes) + Cp * w_buf * 4 + (4 << 20)
    vmem_limit = int(min(max(vmem_est, 32 << 20), 64 << 20))

    return pl.pallas_call(
        _make_tcn_kernel(cfgs, K, T, Cp, c_out, Bn, g0, gap),
        out_shape=jax.ShapeDtypeStruct((N, c_out, T), x_nct.dtype),
        grid=(N // Bn,),
        in_specs=in_specs,
        out_specs=pl.BlockSpec((Bn, c_out, T), lambda n: (n, 0, 0)),
        scratch_shapes=[pltpu.VMEM((Cp, w_buf), jnp.float32)],
        compiler_params=pltpu.CompilerParams(
            dimension_semantics=("parallel",),
            vmem_limit_bytes=vmem_limit),
    )(xp, *flat)


def temporal_conv_net(x_nct, params, K):
    """x_nct: (N, C, T) (PyTorch Conv1d layout).  Eval-mode TCN forward."""
    N, _, T = x_nct.shape
    chans = [x_nct.shape[1]] + [p["w1"].shape[0] for p in params]
    Cp = _rup(max(chans), 8)
    pad_max = max((K - 1) * p["dilation"] // 2 for p in params)

    # Pack Bn batch elements along the lane axis when T under-fills a vreg.
    # (Lane density is prioritized over grid-step count; for larger N both a
    #  dense lane axis and an even number of grid steps are obtained.)
    Bn = min(N, max(1, 128 // max(T, 1))) if T < 128 else 1
    while N % Bn:
        Bn -= 1

    gap = pad_max                                 # zero gap between segments
    g0 = _rup(pad_max, 128) if pad_max > 0 else 0  # lane-aligned left guard

    cfgs, flat = _prepare(params, K, Cp)
    return _tcn_forward(x_nct, flat, cfgs=cfgs, K=K, Cp=Cp, c_out=chans[-1],
                        Bn=Bn, g0=g0, gap=gap)


# ----------------------------------------------------------------------------
# Parameters (PyTorch layouts) and pure-XLA reference for validation
# ----------------------------------------------------------------------------
def init_params(key, num_inputs, num_channels, ksize):
    params = []
    for i, cout in enumerate(num_channels):
        cin = num_inputs if i == 0 else num_channels[i - 1]
        key, *ks = jax.random.split(key, 15)
        p = dict(
            dilation=2 ** i,
            w1=0.3 * jax.random.normal(ks[0], (cout, cin, ksize), jnp.float32),
            b1=0.1 * jax.random.normal(ks[1], (cout,), jnp.float32),
            bn1_g=1.0 + 0.1 * jax.random.normal(ks[2], (cout,), jnp.float32),
            bn1_b=0.1 * jax.random.normal(ks[3], (cout,), jnp.float32),
            bn1_m=0.1 * jax.random.normal(ks[4], (cout,), jnp.float32),
            bn1_v=jax.random.uniform(ks[5], (cout,), jnp.float32, 0.5, 1.5),
            w2=0.3 * jax.random.normal(ks[6], (cout, cout, ksize), jnp.float32),
            b2=0.1 * jax.random.normal(ks[7], (cout,), jnp.float32),
            bn2_g=1.0 + 0.1 * jax.random.normal(ks[8], (cout,), jnp.float32),
            bn2_b=0.1 * jax.random.normal(ks[9], (cout,), jnp.float32),
            bn2_m=0.1 * jax.random.normal(ks[10], (cout,), jnp.float32),
            bn2_v=jax.random.uniform(ks[11], (cout,), jnp.float32, 0.5, 1.5),
            wd=None, bd=None,
        )
        if cin != cout:
            p["wd"] = 0.3 * jax.random.normal(ks[12], (cout, cin), jnp.float32)
            p["bd"] = 0.1 * jax.random.normal(ks[13], (cout,), jnp.float32)
        params.append(p)
    return params


def _reference(x, params, K):
    """Pure-XLA eval-mode reference mirroring the PyTorch module exactly."""
    hp = jax.lax.Precision.HIGHEST
    for p in params:
        d = p["dilation"]
        pad = (K - 1) * d

        def conv(z, w, b):
            y = jax.lax.conv_general_dilated(
                z, w, window_strides=(1,), padding=[(pad, pad)],
                rhs_dilation=(d,), dimension_numbers=("NCH", "OIH", "NCH"),
                precision=hp)
            return y + b[None, :, None]

        def bn(y, g, be, m, v):
            s = (g * jax.lax.rsqrt(v + EPS))[None, :, None]
            return (y - m[None, :, None]) * s + be[None, :, None]

        def chomp(y):                                   # symmetric Chomp1d
            return y[:, :, pad // 2: y.shape[-1] - pad // 2]

        h = jax.nn.relu(chomp(bn(conv(x, p["w1"], p["b1"]), p["bn1_g"],
                                 p["bn1_b"], p["bn1_m"], p["bn1_v"])))
        out = jax.nn.relu(chomp(bn(conv(h, p["w2"], p["b2"]), p["bn2_g"],
                                   p["bn2_b"], p["bn2_m"], p["bn2_v"])))
        if p["wd"] is None:
            res = x
        else:
            res = jnp.einsum("oc,nct->not", p["wd"], x, precision=hp)
            res = res + p["bd"][None, :, None]
        x = jax.nn.relu(out + res)
    return x


if __name__ == "__main__":
    key = jax.random.PRNGKey(0)
    k_x, k_p = jax.random.split(key)

    # TemporalConvNet(num_inputs=4, num_channels=[8, 8],
    #                 options={'kernel_size': 3}) on input (N=2, C=4, T=16)
    num_inputs, num_channels, kernel_size = 4, [8, 8], 3
    N, T = 2, 16

    x = jax.random.normal(k_x, (N, num_inputs, T), jnp.float32)
    params = init_params(k_p, num_inputs, num_channels, kernel_size)

    out = temporal_conv_net(x, params, kernel_size)
    out = jax.block_until_ready(out)

    assert out.shape == (N, num_channels[-1], T), out.shape
    assert bool(jnp.all(jnp.isfinite(out)))
    assert bool(jnp.all(out >= 0.0))                    # final ReLU

    # Validate against the XLA reference.  Tolerance budgets for bf16 MXU
    # operands (f32 accumulation); activations/residuals are stored in f32.
    ref = _reference(x, params, kernel_size)
    err = float(jnp.max(jnp.abs(out - ref)))
    tol = 2.5e-2 * float(jnp.max(jnp.abs(ref))) + 1e-2
    assert err < tol, f"mismatch vs reference: max abs err {err} (tol {tol})"
    print("KERNEL_OK")
</pallas_src>

<mosaic_0001>
module attributes {stable_mosaic.version = 11 : i64} {
  func.func @kernel(%arg0: i32, %arg1: memref<2x8x16xf32, #tpu.memory_space<vmem>>, %arg2: memref<3x8x8xbf16, #tpu.memory_space<vmem>>, %arg3: memref<8x1xf32, #tpu.memory_space<vmem>>, %arg4: memref<3x8x8xbf16, #tpu.memory_space<vmem>>, %arg5: memref<8x1xf32, #tpu.memory_space<vmem>>, %arg6: memref<8x8xbf16, #tpu.memory_space<vmem>>, %arg7: memref<8x1xf32, #tpu.memory_space<vmem>>, %arg8: memref<3x8x8xbf16, #tpu.memory_space<vmem>>, %arg9: memref<8x1xf32, #tpu.memory_space<vmem>>, %arg10: memref<3x8x8xbf16, #tpu.memory_space<vmem>>, %arg11: memref<8x1xf32, #tpu.memory_space<vmem>>, %arg12: memref<2x8x16xf32, #tpu.memory_space<vmem>>, %arg13: memref<8x164xf32, #tpu.memory_space<vmem>>) attributes {dimension_semantics = [#tpu.dimension_semantics<parallel>], iteration_bounds = array<i64: 1>, scalar_prefetch = 0 : i64, scratch_operands = 1 : i64, tpu.core_type = #tpu.core_type<tc>, window_params = [{transform_indices = @transform_0, window_bounds = array<i64: 2, 8, 16>}, {pipeline_mode = #tpu.pipeline_mode<synchronous>, transform_indices = @transform_1, window_bounds = array<i64: 3, 8, 8>}, {pipeline_mode = #tpu.pipeline_mode<synchronous>, transform_indices = @transform_2, window_bounds = array<i64: 8, 1>}, {pipeline_mode = #tpu.pipeline_mode<synchronous>, transform_indices = @transform_3, window_bounds = array<i64: 3, 8, 8>}, {pipeline_mode = #tpu.pipeline_mode<synchronous>, transform_indices = @transform_4, window_bounds = array<i64: 8, 1>}, {pipeline_mode = #tpu.pipeline_mode<synchronous>, transform_indices = @transform_5, window_bounds = array<i64: 8, 8>}, {pipeline_mode = #tpu.pipeline_mode<synchronous>, transform_indices = @transform_6, window_bounds = array<i64: 8, 1>}, {pipeline_mode = #tpu.pipeline_mode<synchronous>, transform_indices = @transform_7, window_bounds = array<i64: 3, 8, 8>}, {pipeline_mode = #tpu.pipeline_mode<synchronous>, transform_indices = @transform_8, window_bounds = array<i64: 8, 1>}, {pipeline_mode = #tpu.pipeline_mode<synchronous>, transform_indices = @transform_9, window_bounds = array<i64: 3, 8, 8>}, {pipeline_mode = #tpu.pipeline_mode<synchronous>, transform_indices = @transform_10, window_bounds = array<i64: 8, 1>}, {transform_indices = @transform_11, window_bounds = array<i64: 2, 8, 16>}]} {
    %cst = arith.constant 0.000000e+00 : f32
    %0 = vector.broadcast %cst : f32 to vector<8x128xf32>
    %c0 = arith.constant 0 : index
    %c0_0 = arith.constant 0 : index
    %1 = vector.load %arg13[%c0, %c0_0] : memref<8x164xf32, #tpu.memory_space<vmem>>, vector<8x128xf32>
    tpu.vector_store %arg13[%c0, %c0_0], %0 {strides = array<i32>} : memref<8x164xf32, #tpu.memory_space<vmem>>, vector<8x128xf32>,
    %cst_1 = arith.constant 0.000000e+00 : f32
    %2 = vector.broadcast %cst_1 : f32 to vector<8x2xf32>
    %c0_2 = arith.constant 0 : index
    %c144 = arith.constant 144 : index
    %3 = vector.load %arg13[%c0_2, %c144] : memref<8x164xf32, #tpu.memory_space<vmem>>, vector<8x2xf32>
    tpu.vector_store %arg13[%c0_2, %c144], %2 {strides = array<i32>} : memref<8x164xf32, #tpu.memory_space<vmem>>, vector<8x2xf32>,
    %cst_3 = arith.constant 0.000000e+00 : f32
    %4 = vector.broadcast %cst_3 : f32 to vector<8x2xf32>
    %c0_4 = arith.constant 0 : index
    %c162 = arith.constant 162 : index
    %5 = vector.load %arg13[%c0_4, %c162] : memref<8x164xf32, #tpu.memory_space<vmem>>, vector<8x2xf32>
    tpu.vector_store %arg13[%c0_4, %c162], %4 {strides = array<i32>} : memref<8x164xf32, #tpu.memory_space<vmem>>, vector<8x2xf32>,
    %c0_5 = arith.constant 0 : index
    %c0_6 = arith.constant 0 : index
    %c0_7 = arith.constant 0 : index
    %6 = vector.load %arg1[%c0_5, %c0_6, %c0_7] : memref<2x8x16xf32, #tpu.memory_space<vmem>>, vector<1x8x16xf32>
    %7 = vector.shape_cast %6 : vector<1x8x16xf32> to vector<8x16xf32>
    %c0_8 = arith.constant 0 : index
    %c128 = arith.constant 128 : index
    %8 = vector.load %arg13[%c0_8, %c128] : memref<8x164xf32, #tpu.memory_space<vmem>>, vector<8x16xf32>
    tpu.vector_store %arg13[%c0_8, %c128], %7 {strides = array<i32>} : memref<8x164xf32, #tpu.memory_space<vmem>>, vector<8x16xf32>,
    %c1 = arith.constant 1 : index
    %c0_9 = arith.constant 0 : index
    %c0_10 = arith.constant 0 : index
    %9 = vector.load %arg1[%c1, %c0_9, %c0_10] : memref<2x8x16xf32, #tpu.memory_space<vmem>>, vector<1x8x16xf32>
    %10 = vector.shape_cast %9 : vector<1x8x16xf32> to vector<8x16xf32>
    %c0_11 = arith.constant 0 : index
    %c146 = arith.constant 146 : index
    %11 = vector.load %arg13[%c0_11, %c146] : memref<8x164xf32, #tpu.memory_space<vmem>>, vector<8x16xf32>
    tpu.vector_store %arg13[%c0_11, %c146], %10 {strides = array<i32>} : memref<8x164xf32, #tpu.memory_space<vmem>>, vector<8x16xf32>,
    %12 = tpu.iota {dimensions = array<i32: 1>} : vector<1x34xi32>
    %c18_i32 = arith.constant 18 : i32
    %c0_i32 = arith.constant 0 : i32
    %13 = arith.cmpi eq, %c18_i32, %c0_i32 : i32
    %c1_i32 = arith.constant 1 : i32
    %14 = arith.select %13, %c1_i32, %c18_i32 : i32
    %15 = vector.broadcast %14 : i32 to vector<1x34xi32>
    %16 = arith.remsi %12, %15 : vector<1x34xi32>
    %c0_i32_12 = arith.constant 0 : i32
    %17 = vector.broadcast %c0_i32_12 : i32 to vector<1x34xi32>
    %18 = arith.cmpi ne, %16, %17 : vector<1x34xi32>
    %c0_i32_13 = arith.constant 0 : i32
    %19 = vector.broadcast %c0_i32_13 : i32 to vector<1x34xi32>
    %20 = arith.cmpi slt, %16, %19 : vector<1x34xi32>
    %c0_i32_14 = arith.constant 0 : i32
    %21 = arith.cmpi slt, %14, %c0_i32_14 : i32
    %22 = vector.broadcast %21 : i1 to vector<1x34xi1>
    %23 = vector.broadcast %22 : vector<1x34xi1> to vector<1x34xi1>
    %24 = arith.xori %20, %23 : vector<1x34xi1>
    %25 = arith.andi %24, %18 : vector<1x34xi1>
    %26 = vector.broadcast %14 : i32 to vector<1x34xi32>
    %27 = arith.addi %16, %26 : vector<1x34xi32>
    %28 = arith.select %25, %27, %16 : vector<1x34xi1>, vector<1x34xi32>
    %c16_i32 = arith.constant 16 : i32
    %29 = vector.broadcast %c16_i32 : i32 to vector<1x34xi32>
    %30 = arith.cmpi slt, %28, %29 : vector<1x34xi32>
    %c0_15 = arith.constant 0 : index
    %c128_16 = arith.constant 128 : index
    %31 = vector.load %arg13[%c0_15, %c128_16] : memref<8x164xf32, #tpu.memory_space<vmem>>, vector<8x34xf32>
    %32 = arith.truncf %31 : vector<8x34xf32> to vector<8x34xbf16>
    %c0_17 = arith.constant 0 : index
    %c0_18 = arith.constant 0 : index
    %33 = vector.load %arg6[%c0_17, %c0_18] : memref<8x8xbf16, #tpu.memory_space<vmem>>, vector<8x8xbf16>
    %cst_19 = arith.constant dense<0.000000e+00> : vector<8x34xf32>
    %34 = tpu.matmul %33, %32, %cst_19 {dimension_numbers = #tpu.dot_dimension_numbers<[1], [0], [0], [1], [0, 0, 1, 1], [], []>} : vector<8x8xbf16>, vector<8x34xbf16>, vector<8x34xf32> -> vector<8x34xf32>
    %c0_20 = arith.constant 0 : index
    %c0_21 = arith.constant 0 : index
    %35 = vector.load %arg7[%c0_20, %c0_21] : memref<8x1xf32, #tpu.memory_space<vmem>>, vector<8x1xf32>
    %36 = vector.broadcast %35 : vector<8x1xf32> to vector<8x34xf32>
    %37 = arith.addf %34, %36 : vector<8x34xf32>
    %c0_22 = arith.constant 0 : index
    %c127 = arith.constant 127 : index
    %38 = vector.load %arg13[%c0_22, %c127] : memref<8x164xf32, #tpu.memory_space<vmem>>, vector<8x34xf32>
    %39 = arith.truncf %38 : vector<8x34xf32> to vector<8x34xbf16>
    %c0_23 = arith.constant 0 : index
    %c0_24 = arith.constant 0 : index
    %c0_25 = arith.constant 0 : index
    %40 = vector.load %arg2[%c0_23, %c0_24, %c0_25] : memref<3x8x8xbf16, #tpu.memory_space<vmem>>, vector<1x8x8xbf16>
    %41 = vector.shape_cast %40 : vector<1x8x8xbf16> to vector<8x8xbf16>
    %cst_26 = arith.constant dense<0.000000e+00> : vector<8x34xf32>
    %42 = tpu.matmul %41, %39, %cst_26 {dimension_numbers = #tpu.dot_dimension_numbers<[1], [0], [0], [1], [0, 0, 1, 1], [], []>} : vector<8x8xbf16>, vector<8x34xbf16>, vector<8x34xf32> -> vector<8x34xf32>
    %c0_27 = arith.constant 0 : index
    %c128_28 = arith.constant 128 : index
    %43 = vector.load %arg13[%c0_27, %c128_28] : memref<8x164xf32, #tpu.memory_space<vmem>>, vector<8x34xf32>
    %44 = arith.truncf %43 : vector<8x34xf32> to vector<8x34xbf16>
    %c1_29 = arith.constant 1 : index
    %c0_30 = arith.constant 0 : index
    %c0_31 = arith.constant 0 : index
    %45 = vector.load %arg2[%c1_29, %c0_30, %c0_31] : memref<3x8x8xbf16, #tpu.memory_space<vmem>>, vector<1x8x8xbf16>
    %46 = vector.shape_cast %45 : vector<1x8x8xbf16> to vector<8x8xbf16>
    %cst_32 = arith.constant dense<0.000000e+00> : vector<8x34xf32>
    %47 = tpu.matmul %46, %44, %cst_32 {dimension_numbers = #tpu.dot_dimension_numbers<[1], [0], [0], [1], [0, 0, 1, 1], [], []>} : vector<8x8xbf16>, vector<8x34xbf16>, vector<8x34xf32> -> vector<8x34xf32>
    %48 = arith.addf %42, %47 : vector<8x34xf32>
    %c0_33 = arith.constant 0 : index
    %c129 = arith.constant 129 : index
    %49 = vector.load %arg13[%c0_33, %c129] : memref<8x164xf32, #tpu.memory_space<vmem>>, vector<8x34xf32>
    %50 = arith.truncf %49 : vector<8x34xf32> to vector<8x34xbf16>
    %c2 = arith.constant 2 : index
    %c0_34 = arith.constant 0 : index
    %c0_35 = arith.constant 0 : index
    %51 = vector.load %arg2[%c2, %c0_34, %c0_35] : memref<3x8x8xbf16, #tpu.memory_space<vmem>>, vector<1x8x8xbf16>
    %52 = vector.shape_cast %51 : vector<1x8x8xbf16> to vector<8x8xbf16>
    %cst_36 = arith.constant dense<0.000000e+00> : vector<8x34xf32>
    %53 = tpu.matmul %52, %50, %cst_36 {dimension_numbers = #tpu.dot_dimension_numbers<[1], [0], [0], [1], [0, 0, 1, 1], [], []>} : vector<8x8xbf16>, vector<8x34xbf16>, vector<8x34xf32> -> vector<8x34xf32>
    %54 = arith.addf %48, %53 : vector<8x34xf32>
    %c0_37 = arith.constant 0 : index
    %c0_38 = arith.constant 0 : index
    %55 = vector.load %arg3[%c0_37, %c0_38] : memref<8x1xf32, #tpu.memory_space<vmem>>, vector<8x1xf32>
    %56 = vector.broadcast %55 : vector<8x1xf32> to vector<8x34xf32>
    %57 = arith.addf %54, %56 : vector<8x34xf32>
    %cst_39 = arith.constant 0.000000e+00 : f32
    %58 = vector.broadcast %cst_39 : f32 to vector<8x34xf32>
    %59 = arith.maximumf %57, %58 : vector<8x34xf32>
    %cst_40 = arith.constant 0.000000e+00 : f32
    %60 = vector.shape_cast %30 : vector<1x34xi1> to vector<1x34xi1>
    %61 = vector.broadcast %60 : vector<1x34xi1> to vector<8x34xi1>
    %62 = vector.broadcast %cst_40 : f32 to vector<8x34xf32>
    %63 = arith.select %61, %59, %62 : vector<8x34xi1>, vector<8x34xf32>
    %c0_41 = arith.constant 0 : index
    %c128_42 = arith.constant 128 : index
    %64 = vector.load %arg13[%c0_41, %c128_42] : memref<8x164xf32, #tpu.memory_space<vmem>>, vector<8x34xf32>
    tpu.vector_store %arg13[%c0_41, %c128_42], %63 {strides = array<i32>} : memref<8x164xf32, #tpu.memory_space<vmem>>, vector<8x34xf32>,
    %c0_43 = arith.constant 0 : index
    %c127_44 = arith.constant 127 : index
    %65 = vector.load %arg13[%c0_43, %c127_44] : memref<8x164xf32, #tpu.memory_space<vmem>>, vector<8x34xf32>
    %66 = arith.truncf %65 : vector<8x34xf32> to vector<8x34xbf16>
    %c0_45 = arith.constant 0 : index
    %c0_46 = arith.constant 0 : index
    %c0_47 = arith.constant 0 : index
    %67 = vector.load %arg4[%c0_45, %c0_46, %c0_47] : memref<3x8x8xbf16, #tpu.memory_space<vmem>>, vector<1x8x8xbf16>
    %68 = vector.shape_cast %67 : vector<1x8x8xbf16> to vector<8x8xbf16>
    %cst_48 = arith.constant dense<0.000000e+00> : vector<8x34xf32>
    %69 = tpu.matmul %68, %66, %cst_48 {dimension_numbers = #tpu.dot_dimension_numbers<[1], [0], [0], [1], [0, 0, 1, 1], [], []>} : vector<8x8xbf16>, vector<8x34xbf16>, vector<8x34xf32> -> vector<8x34xf32>
    %c0_49 = arith.constant 0 : index
    %c128_50 = arith.constant 128 : index
    %70 = vector.load %arg13[%c0_49, %c128_50] : memref<8x164xf32, #tpu.memory_space<vmem>>, vector<8x34xf32>
    %71 = arith.truncf %70 : vector<8x34xf32> to vector<8x34xbf16>
    %c1_51 = arith.constant 1 : index
    %c0_52 = arith.constant 0 : index
    %c0_53 = arith.constant 0 : index
    %72 = vector.load %arg4[%c1_51, %c0_52, %c0_53] : memref<3x8x8xbf16, #tpu.memory_space<vmem>>, vector<1x8x8xbf16>
    %73 = vector.shape_cast %72 : vector<1x8x8xbf16> to vector<8x8xbf16>
    %cst_54 = arith.constant dense<0.000000e+00> : vector<8x34xf32>
    %74 = tpu.matmul %73, %71, %cst_54 {dimension_numbers = #tpu.dot_dimension_numbers<[1], [0], [0], [1], [0, 0, 1, 1], [], []>} : vector<8x8xbf16>, vector<8x34xbf16>, vector<8x34xf32> -> vector<8x34xf32>
    %75 = arith.addf %69, %74 : vector<8x34xf32>
    %c0_55 = arith.constant 0 : index
    %c129_56 = arith.constant 129 : index
    %76 = vector.load %arg13[%c0_55, %c129_56] : memref<8x164xf32, #tpu.memory_space<vmem>>, vector<8x34xf32>
    %77 = arith.truncf %76 : vector<8x34xf32> to vector<8x34xbf16>
    %c2_57 = arith.constant 2 : index
    %c0_58 = arith.constant 0 : index
    %c0_59 = arith.constant 0 : index
    %78 = vector.load %arg4[%c2_57, %c0_58, %c0_59] : memref<3x8x8xbf16, #tpu.memory_space<vmem>>, vector<1x8x8xbf16>
    %79 = vector.shape_cast %78 : vector<1x8x8xbf16> to vector<8x8xbf16>
    %cst_60 = arith.constant dense<0.000000e+00> : vector<8x34xf32>
    %80 = tpu.matmul %79, %77, %cst_60 {dimension_numbers = #tpu.dot_dimension_numbers<[1], [0], [0], [1], [0, 0, 1, 1], [], []>} : vector<8x8xbf16>, vector<8x34xbf16>, vector<8x34xf32> -> vector<8x34xf32>
    %81 = arith.addf %75, %80 : vector<8x34xf32>
    %c0_61 = arith.constant 0 : index
    %c0_62 = arith.constant 0 : index
    %82 = vector.load %arg5[%c0_61, %c0_62] : memref<8x1xf32, #tpu.memory_space<vmem>>, vector<8x1xf32>
    %83 = vector.broadcast %82 : vector<8x1xf32> to vector<8x34xf32>
    %84 = arith.addf %81, %83 : vector<8x34xf32>
    %cst_63 = arith.constant 0.000000e+00 : f32
    %85 = vector.broadcast %cst_63 : f32 to vector<8x34xf32>
    %86 = arith.maximumf %84, %85 : vector<8x34xf32>
    %87 = arith.addf %86, %37 : vector<8x34xf32>
    %cst_64 = arith.constant 0.000000e+00 : f32
    %88 = vector.broadcast %cst_64 : f32 to vector<8x34xf32>
    %89 = arith.maximumf %87, %88 : vector<8x34xf32>
    %cst_65 = arith.constant 0.000000e+00 : f32
    %90 = vector.shape_cast %30 : vector<1x34xi1> to vector<1x34xi1>
    %91 = vector.broadcast %90 : vector<1x34xi1> to vector<8x34xi1>
    %92 = vector.broadcast %cst_65 : f32 to vector<8x34xf32>
    %93 = arith.select %91, %89, %92 : vector<8x34xi1>, vector<8x34xf32>
    %c0_66 = arith.constant 0 : index
    %c128_67 = arith.constant 128 : index
    %94 = vector.load %arg13[%c0_66, %c128_67] : memref<8x164xf32, #tpu.memory_space<vmem>>, vector<8x34xf32>
    tpu.vector_store %arg13[%c0_66, %c128_67], %93 {strides = array<i32>} : memref<8x164xf32, #tpu.memory_space<vmem>>, vector<8x34xf32>,
    %c0_68 = arith.constant 0 : index
    %c128_69 = arith.constant 128 : index
    %95 = vector.load %arg13[%c0_68, %c128_69] : memref<8x164xf32, #tpu.memory_space<vmem>>, vector<8x34xf32>
    %c0_70 = arith.constant 0 : index
    %c126 = arith.constant 126 : index
    %96 = vector.load %arg13[%c0_70, %c126] : memref<8x164xf32, #tpu.memory_space<vmem>>, vector<8x34xf32>
    %97 = arith.truncf %96 : vector<8x34xf32> to vector<8x34xbf16>
    %c0_71 = arith.constant 0 : index
    %c0_72 = arith.constant 0 : index
    %c0_73 = arith.constant 0 : index
    %98 = vector.load %arg8[%c0_71, %c0_72, %c0_73] : memref<3x8x8xbf16, #tpu.memory_space<vmem>>, vector<1x8x8xbf16>
    %99 = vector.shape_cast %98 : vector<1x8x8xbf16> to vector<8x8xbf16>
    %cst_74 = arith.constant dense<0.000000e+00> : vector<8x34xf32>
    %100 = tpu.matmul %99, %97, %cst_74 {dimension_numbers = #tpu.dot_dimension_numbers<[1], [0], [0], [1], [0, 0, 1, 1], [], []>} : vector<8x8xbf16>, vector<8x34xbf16>, vector<8x34xf32> -> vector<8x34xf32>
    %c0_75 = arith.constant 0 : index
    %c128_76 = arith.constant 128 : index
    %101 = vector.load %arg13[%c0_75, %c128_76] : memref<8x164xf32, #tpu.memory_space<vmem>>, vector<8x34xf32>
    %102 = arith.truncf %101 : vector<8x34xf32> to vector<8x34xbf16>
    %c1_77 = arith.constant 1 : index
    %c0_78 = arith.constant 0 : index
    %c0_79 = arith.constant 0 : index
    %103 = vector.load %arg8[%c1_77, %c0_78, %c0_79] : memref<3x8x8xbf16, #tpu.memory_space<vmem>>, vector<1x8x8xbf16>
    %104 = vector.shape_cast %103 : vector<1x8x8xbf16> to vector<8x8xbf16>
    %cst_80 = arith.constant dense<0.000000e+00> : vector<8x34xf32>
    %105 = tpu.matmul %104, %102, %cst_80 {dimension_numbers = #tpu.dot_dimension_numbers<[1], [0], [0], [1], [0, 0, 1, 1], [], []>} : vector<8x8xbf16>, vector<8x34xbf16>, vector<8x34xf32> -> vector<8x34xf32>
    %106 = arith.addf %100, %105 : vector<8x34xf32>
    %c0_81 = arith.constant 0 : index
    %c130 = arith.constant 130 : index
    %107 = vector.load %arg13[%c0_81, %c130] : memref<8x164xf32, #tpu.memory_space<vmem>>, vector<8x34xf32>
    %108 = arith.truncf %107 : vector<8x34xf32> to vector<8x34xbf16>
    %c2_82 = arith.constant 2 : index
    %c0_83 = arith.constant 0 : index
    %c0_84 = arith.constant 0 : index
    %109 = vector.load %arg8[%c2_82, %c0_83, %c0_84] : memref<3x8x8xbf16, #tpu.memory_space<vmem>>, vector<1x8x8xbf16>
    %110 = vector.shape_cast %109 : vector<1x8x8xbf16> to vector<8x8xbf16>
    %cst_85 = arith.constant dense<0.000000e+00> : vector<8x34xf32>
    %111 = tpu.matmul %110, %108, %cst_85 {dimension_numbers = #tpu.dot_dimension_numbers<[1], [0], [0], [1], [0, 0, 1, 1], [], []>} : vector<8x8xbf16>, vector<8x34xbf16>, vector<8x34xf32> -> vector<8x34xf32>
    %112 = arith.addf %106, %111 : vector<8x34xf32>
    %c0_86 = arith.constant 0 : index
    %c0_87 = arith.constant 0 : index
    %113 = vector.load %arg9[%c0_86, %c0_87] : memref<8x1xf32, #tpu.memory_space<vmem>>, vector<8x1xf32>
    %114 = vector.broadcast %113 : vector<8x1xf32> to vector<8x34xf32>
    %115 = arith.addf %112, %114 : vector<8x34xf32>
    %cst_88 = arith.constant 0.000000e+00 : f32
    %116 = vector.broadcast %cst_88 : f32 to vector<8x34xf32>
    %117 = arith.maximumf %115, %116 : vector<8x34xf32>
    %cst_89 = arith.constant 0.000000e+00 : f32
    %118 = vector.shape_cast %30 : vector<1x34xi1> to vector<1x34xi1>
    %119 = vector.broadcast %118 : vector<1x34xi1> to vector<8x34xi1>
    %120 = vector.broadcast %cst_89 : f32 to vector<8x34xf32>
    %121 = arith.select %119, %117, %120 : vector<8x34xi1>, vector<8x34xf32>
    %c0_90 = arith.constant 0 : index
    %c128_91 = arith.constant 128 : index
    %122 = vector.load %arg13[%c0_90, %c128_91] : memref<8x164xf32, #tpu.memory_space<vmem>>, vector<8x34xf32>
    tpu.vector_store %arg13[%c0_90, %c128_91], %121 {strides = array<i32>} : memref<8x164xf32, #tpu.memory_space<vmem>>, vector<8x34xf32>,
    %c0_92 = arith.constant 0 : index
    %c126_93 = arith.constant 126 : index
    %123 = vector.load %arg13[%c0_92, %c126_93] : memref<8x164xf32, #tpu.memory_space<vmem>>, vector<8x34xf32>
    %124 = arith.truncf %123 : vector<8x34xf32> to vector<8x34xbf16>
    %c0_94 = arith.constant 0 : index
    %c0_95 = arith.constant 0 : index
    %c0_96 = arith.constant 0 : index
    %125 = vector.load %arg10[%c0_94, %c0_95, %c0_96] : memref<3x8x8xbf16, #tpu.memory_space<vmem>>, vector<1x8x8xbf16>
    %126 = vector.shape_cast %125 : vector<1x8x8xbf16> to vector<8x8xbf16>
    %cst_97 = arith.constant dense<0.000000e+00> : vector<8x34xf32>
    %127 = tpu.matmul %126, %124, %cst_97 {dimension_numbers = #tpu.dot_dimension_numbers<[1], [0], [0], [1], [0, 0, 1, 1], [], []>} : vector<8x8xbf16>, vector<8x34xbf16>, vector<8x34xf32> -> vector<8x34xf32>
    %c0_98 = arith.constant 0 : index
    %c128_99 = arith.constant 128 : index
    %128 = vector.load %arg13[%c0_98, %c128_99] : memref<8x164xf32, #tpu.memory_space<vmem>>, vector<8x34xf32>
    %129 = arith.truncf %128 : vector<8x34xf32> to vector<8x34xbf16>
    %c1_100 = arith.constant 1 : index
    %c0_101 = arith.constant 0 : index
    %c0_102 = arith.constant 0 : index
    %130 = vector.load %arg10[%c1_100, %c0_101, %c0_102] : memref<3x8x8xbf16, #tpu.memory_space<vmem>>, vector<1x8x8xbf16>
    %131 = vector.shape_cast %130 : vector<1x8x8xbf16> to vector<8x8xbf16>
    %cst_103 = arith.constant dense<0.000000e+00> : vector<8x34xf32>
    %132 = tpu.matmul %131, %129, %cst_103 {dimension_numbers = #tpu.dot_dimension_numbers<[1], [0], [0], [1], [0, 0, 1, 1], [], []>} : vector<8x8xbf16>, vector<8x34xbf16>, vector<8x34xf32> -> vector<8x34xf32>
    %133 = arith.addf %127, %132 : vector<8x34xf32>
    %c0_104 = arith.constant 0 : index
    %c130_105 = arith.constant 130 : index
    %134 = vector.load %arg13[%c0_104, %c130_105] : memref<8x164xf32, #tpu.memory_space<vmem>>, vector<8x34xf32>
    %135 = arith.truncf %134 : vector<8x34xf32> to vector<8x34xbf16>
    %c2_106 = arith.constant 2 : index
    %c0_107 = arith.constant 0 : index
    %c0_108 = arith.constant 0 : index
    %136 = vector.load %arg10[%c2_106, %c0_107, %c0_108] : memref<3x8x8xbf16, #tpu.memory_space<vmem>>, vector<1x8x8xbf16>
    %137 = vector.shape_cast %136 : vector<1x8x8xbf16> to vector<8x8xbf16>
    %cst_109 = arith.constant dense<0.000000e+00> : vector<8x34xf32>
    %138 = tpu.matmul %137, %135, %cst_109 {dimension_numbers = #tpu.dot_dimension_numbers<[1], [0], [0], [1], [0, 0, 1, 1], [], []>} : vector<8x8xbf16>, vector<8x34xbf16>, vector<8x34xf32> -> vector<8x34xf32>
    %139 = arith.addf %133, %138 : vector<8x34xf32>
    %c0_110 = arith.constant 0 : index
    %c0_111 = arith.constant 0 : index
    %140 = vector.load %arg11[%c0_110, %c0_111] : memref<8x1xf32, #tpu.memory_space<vmem>>, vector<8x1xf32>
    %141 = vector.broadcast %140 : vector<8x1xf32> to vector<8x34xf32>
    %142 = arith.addf %139, %141 : vector<8x34xf32>
    %cst_112 = arith.constant 0.000000e+00 : f32
    %143 = vector.broadcast %cst_112 : f32 to vector<8x34xf32>
    %144 = arith.maximumf %142, %143 : vector<8x34xf32>
    %145 = arith.addf %144, %95 : vector<8x34xf32>
    %cst_113 = arith.constant 0.000000e+00 : f32
    %146 = vector.broadcast %cst_113 : f32 to vector<8x34xf32>
    %147 = arith.maximumf %145, %146 : vector<8x34xf32>
    %148 = vector.extract_strided_slice %147 {offsets = [0, 0], sizes = [8, 16], strides = [1, 1]} : vector<8x34xf32> to vector<8x16xf32>
    %c0_114 = arith.constant 0 : index
    %c0_115 = arith.constant 0 : index
    %c0_116 = arith.constant 0 : index
    %149 = vector.load %arg12[%c0_114, %c0_115, %c0_116] : memref<2x8x16xf32, #tpu.memory_space<vmem>>, vector<1x8x16xf32>
    %150 = vector.shape_cast %149 : vector<1x8x16xf32> to vector<8x16xf32>
    %151 = vector.shape_cast %148 : vector<8x16xf32> to vector<1x8x16xf32>
    tpu.vector_store %arg12[%c0_114, %c0_115, %c0_116], %151 {strides = array<i32>} : memref<2x8x16xf32, #tpu.memory_space<vmem>>, vector<1x8x16xf32>,
    %152 = vector.extract_strided_slice %147 {offsets = [0, 18], sizes = [8, 16], strides = [1, 1]} : vector<8x34xf32> to vector<8x16xf32>
    %c1_117 = arith.constant 1 : index
    %c0_118 = arith.constant 0 : index
    %c0_119 = arith.constant 0 : index
    %153 = vector.load %arg12[%c1_117, %c0_118, %c0_119] : memref<2x8x16xf32, #tpu.memory_space<vmem>>, vector<1x8x16xf32>
    %154 = vector.shape_cast %153 : vector<1x8x16xf32> to vector<8x16xf32>
    %155 = vector.shape_cast %152 : vector<8x16xf32> to vector<1x8x16xf32>
    tpu.vector_store %arg12[%c1_117, %c0_118, %c0_119], %155 {strides = array<i32>} : memref<2x8x16xf32, #tpu.memory_space<vmem>>, vector<1x8x16xf32>,
    return
  }
  func.func @transform_0(%arg0: i32) -> (i32, i32, i32) {
    %c0_i32 = arith.constant 0 : i32
    %c0_i32_0 = arith.constant 0 : i32
    %c0_i32_1 = arith.constant 0 : i32
    return %arg0, %c0_i32, %c0_i32_0 : i32, i32, i32
  }
  func.func @transform_1(%arg0: i32) -> (i32, i32, i32) {
    %c0_i32 = arith.constant 0 : i32
    %c0_i32_0 = arith.constant 0 : i32
    %c0_i32_1 = arith.constant 0 : i32
    %c0_i32_2 = arith.constant 0 : i32
    return %c0_i32, %c0_i32_0, %c0_i32_1 : i32, i32, i32
  }
  func.func @transform_2(%arg0: i32) -> (i32, i32) {
    %c0_i32 = arith.constant 0 : i32
    %c0_i32_0 = arith.constant 0 : i32
    %c0_i32_1 = arith.constant 0 : i32
    return %c0_i32, %c0_i32_0 : i32, i32
  }
  func.func @transform_3(%arg0: i32) -> (i32, i32, i32) {
    %c0_i32 = arith.constant 0 : i32
    %c0_i32_0 = arith.constant 0 : i32
    %c0_i32_1 = arith.constant 0 : i32
    %c0_i32_2 = arith.constant 0 : i32
    return %c0_i32, %c0_i32_0, %c0_i32_1 : i32, i32, i32
  }
  func.func @transform_4(%arg0: i32) -> (i32, i32) {
    %c0_i32 = arith.constant 0 : i32
    %c0_i32_0 = arith.constant 0 : i32
    %c0_i32_1 = arith.constant 0 : i32
    return %c0_i32, %c0_i32_0 : i32, i32
  }
  func.func @transform_5(%arg0: i32) -> (i32, i32) {
    %c0_i32 = arith.constant 0 : i32
    %c0_i32_0 = arith.constant 0 : i32
    %c0_i32_1 = arith.constant 0 : i32
    return %c0_i32, %c0_i32_0 : i32, i32
  }
  func.func @transform_6(%arg0: i32) -> (i32, i32) {
    %c0_i32 = arith.constant 0 : i32
    %c0_i32_0 = arith.constant 0 : i32
    %c0_i32_1 = arith.constant 0 : i32
    return %c0_i32, %c0_i32_0 : i32, i32
  }
  func.func @transform_7(%arg0: i32) -> (i32, i32, i32) {
    %c0_i32 = arith.constant 0 : i32
    %c0_i32_0 = arith.constant 0 : i32
    %c0_i32_1 = arith.constant 0 : i32
    %c0_i32_2 = arith.constant 0 : i32
    return %c0_i32, %c0_i32_0, %c0_i32_1 : i32, i32, i32
  }
  func.func @transform_8(%arg0: i32) -> (i32, i32) {
    %c0_i32 = arith.constant 0 : i32
    %c0_i32_0 = arith.constant 0 : i32
    %c0_i32_1 = arith.constant 0 : i32
    return %c0_i32, %c0_i32_0 : i32, i32
  }
  func.func @transform_9(%arg0: i32) -> (i32, i32, i32) {
    %c0_i32 = arith.constant 0 : i32
    %c0_i32_0 = arith.constant 0 : i32
    %c0_i32_1 = arith.constant 0 : i32
    %c0_i32_2 = arith.constant 0 : i32
    return %c0_i32, %c0_i32_0, %c0_i32_1 : i32, i32, i32
  }
  func.func @transform_10(%arg0: i32) -> (i32, i32) {
    %c0_i32 = arith.constant 0 : i32
    %c0_i32_0 = arith.constant 0 : i32
    %c0_i32_1 = arith.constant 0 : i32
    return %c0_i32, %c0_i32_0 : i32, i32
  }
  func.func @transform_11(%arg0: i32) -> (i32, i32, i32) {
    %c0_i32 = arith.constant 0 : i32
    %c0_i32_0 = arith.constant 0 : i32
    %c0_i32_1 = arith.constant 0 : i32
    return %arg0, %c0_i32, %c0_i32_0 : i32, i32, i32
  }
}

</mosaic_0001>

<bundles_post_ra>
// kernel: _tcn_forward.1
= control target key start
LH: loop header
LB: loop body
LE: loop exit
PB: predicated region body
PF: predicated region fallthrough
CT: control target
= control target key end

     0   :  { %vm41_vm0 = vcmask 146560   ;;  %vm43_vm1 = vcmask 294160   ;;  %s991_s19 = smov 18   ;;  %v992_v1 = vmov 0.0   ;;  %vm46_vm2 = vcmask 130048   ;;  %s1250_s0 = inlined_call_operand.vmem [shape: f32[2,8,16], index: 0, kind: input, shape index: {}]   ;;  %s1251_s1 = inlined_call_operand.vmem [shape: bf16[3,8,8], index: 1, kind: input, shape index: {}]   ;;  %s1252_s2 = inlined_call_operand.vmem [shape: f32[8,1], index: 2, kind: input, shape index: {}]   ;;  %s1253_s3 = inlined_call_operand.vmem [shape: bf16[3,8,8], index: 3, kind: input, shape index: {}]   ;;  %s1254_s4 = inlined_call_operand.vmem [shape: f32[8,1], index: 4, kind: input, shape index: {}]   ;;  %s1255_s5 = inlined_call_operand.vmem [shape: bf16[8,8], index: 5, kind: input, shape index: {}]   ;;  %s1256_s6 = inlined_call_operand.vmem [shape: f32[8,1], index: 6, kind: input, shape index: {}]   ;;  %s1257_s7 = inlined_call_operand.vmem [shape: bf16[3,8,8], index: 7, kind: input, shape index: {}]   ;;  %s1258_s8 = inlined_call_operand.vmem [shape: f32[8,1], index: 8, kind: input, shape index: {}]   ;;  %s1259_s9 = inlined_call_operand.vmem [shape: bf16[3,8,8], index: 9, kind: input, shape index: {}]   ;;  %s1260_s10 = inlined_call_operand.vmem [shape: f32[8,1], index: 10, kind: input, shape index: {}]   ;;  %s1261_s11 = inlined_call_operand.hbm [shape: f32[2,8,16], index: 11, kind: output, shape index: {}]  }
   0x1   :  { %v825_v0 = vld [vmem:[%s1250_s0 + $0x8] sm:$0xff]  ;;  %42 = vst.msk [vmem:[#allocation2 + $0x8] sm:$0xff] %vm41_vm0, %v992_v1  ;;  %v45_v2 = vld [vmem:[%s1250_s0] sm:$0xff]  ;;  %873 = vmatprep.subr.bf16.mxu0 %v992_v1  ;;  %879 = vmatprep.subr.bf16.mxu1 %v992_v1  ;;  %vm993_vm3 = vmmov 0  }
   0x2   :  { %51 = vrot.lane.b32.xlu0 %v825_v0, %s991_s19  ;;  %44 = vst.msk [vmem:[#allocation2 + $0x8] sm:$0xff] %vm43_vm1, %v992_v1  ;;  %875 = vmatprep.mubr.msk.bf16.mxu0 %vm993_vm3, %v992_v1 }
   0x3   :  { %47 = vst.msk [vmem:[#allocation2 + $0x8] sm:$0xff] %vm46_vm2, %v45_v2  ;;  %881 = vmatprep.mubr.msk.bf16.mxu1 %vm993_vm3, %v992_v1 }
   0x4   :  { %16 = vsyncpa [#allocation4], 0  ;;  %v994_v3 = vmov 0.0|0.0   ;;  %s995_s22 = smov 1   ;;  %vm54_vm4 = vcmask 277648   ;;  %v285_v5 = vld [vmem:[%s1252_s2] sm:$0xff]  ;;  %v56_v28 = vlaneseq }
   0x5   :  { %v996_v6 = vmov 0   ;;  %vm88_vm5 = vcmask 1043456   ;;  %v77_v10 = vld [vmem:[%s1255_s5] sm:$0xf]  ;;  %vm84_vm6 = vcmask 64512   ;;  %s997_s27 = smov 127  }
   0x6   :  { %182 = vrot.lane.b32.xlu0 %v994_v3, %s995_s22  ;;  %966 = vset.pattern.permute.xlu1 %v996_v6  ;;  %v827_v11 = vld [vmem:[%s1251_s1 + $0x4] sm:$0xf]  ;;  %vm186_vm7 = vcmask 7168   ;;  %v134_v16 = vld [vmem:[%s1251_s1] sm:$0xf]  ;;  %v57_v29 = vand.u32 127, %v56_v28 }
   0x7   :  { %965 = vset.pattern.permute.xlu0 %v996_v6  ;;  %v830_v19 = vld [vmem:[%s1251_s1 + $0x8] sm:$0xf]  ;;  %vm296_vm12 = vcmask 277504   ;;  %v78_v55 = vld [vmem:[%s1256_s6] sm:$0xff]  ;;  %s998_s19 = smov 2   ;;  %vm526_vm13 = vcmask 15360  }
   0x8   :  { %v1122_v30 = vmul.u32.u64.low 3817748708, %v57_v29  ;;  %v1123_v31 = vmul.u32.u64.high 3817748708, %v57_v29, %v1122_v30  ;;  %v832_v56 = vld [vmem:[%s1253_s3 + $0x4] sm:$0xf]  ;;  %v835_v0 = vld [vmem:[%s1253_s3 + $0x8] sm:$0xf] }
   0x9   :  { %v455_v57 = vld [vmem:[%s1254_s4] sm:$0xff]  ;;  %s1001_s30 = smov [#allocation3]  }
   0xa   :  { %288 = vperm.xlu0 %965, %v285_v5   ;;  %v64_v32 = vshrl.u32 %v1123_v31, 4  ;;  %v302_v2 = vld [vmem:[%s1253_s3] sm:$0xf]  ;;  %s999_s3 = smov 126   ;;  %v837_v30 = vld [vmem:[%s1257_s7 + $0x4] sm:$0xf] }
   0xb   :  { %v842_v49 = vld [vmem:[%s1259_s9 + $0x4] sm:$0xf]  ;;  %s814_s1 = sshll.u32 %s1001_s30, 4  ;;  %s815_s1 = int_to_ptr.vmem [resolvable:$true] %s814_s1 }
   0xc   :  { %v65_v33 = vmul.u32 18, %v64_v32  ;;  %s967_s12 = scalar_lea.vmem %s815_s1, 256  ;;  %p972_p1 = scmp.lt.s32.totalorder %s815_s1, %s815_s1 }
   0xd   :  { %p968_p0 = scmp.ne.s32.totalorder %s815_s1, %s967_s12  ;;  %p973_p2 = scmp.lt.s32.totalorder %s967_s12, %s967_s12 }
   0xe   :  { %v66_v34 = vsub.s32 %v57_v29, %v65_v33  ;;  %v625_v29 = vld [vmem:[%s1258_s8] sm:$0xff] }
   0xf   :  { %p974_p3 = por %p973_p2, %p972_p1 }
  0x10   :  { %vm69_vm8 = vcmp.ne.s32.totalorder %v66_v34, 0  ;;  %vm70_vm9 = vcmp.lt.s32.totalorder %v66_v34, 0  ;;  %v72_v36 = vadd.s32 18, %v66_v34 }
  0x11   :  { %vm71_vm10 = vmand %vm70_vm9, %vm69_vm8  ;;  %p975_p4 = pnand %p974_p3, %p968_p0 }
  0x12   :  { %v73_v45 = vsel %vm71_vm10, %v72_v36, %v66_v34 }
  0x13   :  { %vm1126_vm11 = vcmp.lt.s32.totalorder %v73_v45, 16 }
  0x74   :  { %v52_v4 = vpop.permute.xlu0 %51 }
  0x75   :  { %55 = vst.msk [vmem:[#allocation2 + $0x8] sm:$0xff] %vm54_vm4, %v52_v4 }
  0x78   :  { %v183_v12 = vpop.permute.xlu0 %182 }
  0x7c   :  { %v75_v7 = vld [vmem:[#allocation2 + $0x8] sm:$0xff] }
  0x7d   :  { %v76_v8 = vpack.c.bf16 %v75_v7, %v75_v7 }
  0x7f   :  { %184 = vrot.lane.b32.xlu1 %v76_v8, %s995_s22  ;;  %v90_v9 = vsel %vm88_vm5, %v76_v8, 0 }
  0x80   :  { %874 = vmatpush3.bf16.msra.mxu0 %v90_v9  ;;  %880 = vmatpush3.bf16.msra.mxu1 %v90_v9 }
  0x81   :  { %885 = vmatprep.subr.bf16.mxu0 %v992_v1  ;;  %891 = vmatprep.subr.bf16.mxu1 %v992_v1 }
  0x83   :  { %236 = vrot.lane.b32.xlu1 %v76_v8, %s997_s27  ;;  %876 = vmatmul.mubr.msk.bf16.vlgmr.msra.gmra.mrb[0].mxu0 %vm84_vm6, %v77_v10 }
  0x84   :  { %882 = vmatmul.mubr.msk.bf16.vlgmr.msra.gmra.mrb[0].mxu1 %vm84_vm6, %v827_v11  ;;  %887 = vmatprep.mubr.msk.bf16.mxu0 %vm993_vm3, %v992_v1 }
  0x85   :  { %893 = vmatprep.mubr.msk.bf16.mxu1 %vm993_vm3, %v992_v1 }
  0x87   :  { %353 = vrot.lane.b32.xlu1 %v994_v3, %s995_s22 }
  0x89   :  { %v289_v40 = vpop.permute.xlu0 %288 }
  0xf1   :  { %v185_v13 = vpop.permute.xlu1 %184 }
  0xf2   :  { %v187_v14 = vsel %vm186_vm7, %v183_v12, %v185_v13 }
  0xf3   :  { %v192_v15 = vsel %vm88_vm5, %v187_v14, 0 }
  0xf4   :  { %886 = vmatpush3.bf16.msra.mxu0 %v192_v15 }
  0xf5   :  { %v237_v17 = vpop.permute.xlu1 %236  ;;  %897 = vmatprep.subr.bf16.mxu0 %v992_v1 }
  0xf6   :  { %v242_v18 = vsel %vm88_vm5, %v237_v17, 0 }
  0xf7   :  { %888 = vmatmul.mubr.msk.bf16.vlgmr.msra.gmra.mrb[4].mxu0 %vm84_vm6, %v134_v16  ;;  %892 = vmatpush3.bf16.msra.mxu1 %v242_v18 }
  0xf8   :  { %899 = vmatprep.mubr.msk.bf16.mxu0 %vm993_vm3, %v992_v1  ;;  %903 = vmatprep.subr.bf16.mxu1 %v992_v1 }
  0xf9   :  { %v354_v58 = vpop.permute.xlu1 %353 }
  0xfa   :  { %894 = vmatmul.mubr.msk.bf16.vlgmr.msra.gmra.mrb[4].mxu1 %vm84_vm6, %v830_v19 }
  0xfb   :  { %905 = vmatprep.mubr.msk.bf16.mxu1 %vm993_vm3, %v992_v1 }
 0x156   :  { %v1120_v20 = vpop.f32.mrb[0].mxu0 }
 0x157   :  { %v877_v21 = vpop.f32.mrb[1].mxu0  ;;  %v174_v22 = vpop.f32.mrb[0].mxu1 }
 0x158   :  { %v129_v23 = vpop.f32.mrb[2].mxu0  ;;  %v883_v24 = vpop.f32.mrb[1].mxu1 }
 0x159   :  { %v878_v25 = vpop.f32.mrb[3].mxu0  ;;  %v177_v26 = vpop.f32.mrb[2].mxu1 }
 0x15a   :  { %v884_v27 = vpop.f32.mrb[3].mxu1 }
 0x1ca   :  { %v228_v35 = vpop.f32.mrb[4].mxu0 }
 0x1cb   :  { %v229_v37 = vadd.f32 %v228_v35, %v174_v22  ;;  %v889_v38 = vpop.f32.mrb[5].mxu0 }
 0x1cc   :  { %v231_v39 = vpop.f32.mrb[6].mxu0 }
 0x1cd   :  { %v890_v41 = vpop.f32.mrb[7].mxu0  ;;  %v278_v42 = vpop.f32.mrb[4].mxu1 }
 0x1ce   :  { %v284_v43 = vadd.f32 %v278_v42, %v229_v37  ;;  %v895_v44 = vpop.f32.mrb[5].mxu1  ;;  %v840_v37 = vld [vmem:[%s1257_s7 + $0x8] sm:$0xf] }
 0x1cf   :  { %v281_v46 = vpop.f32.mrb[6].mxu1 }
 0x1d0   :  { %v291_v47 = vadd.f32 %v289_v40, %v284_v43  ;;  %v896_v48 = vpop.f32.mrb[7].mxu1 }
 0x1d2   :  { %v292_v50 = vmax.f32 %v291_v47, 0.0 }
 0x1d4   :  { %v295_v51 = vsel %vm1126_vm11, %v292_v50, 0.0 }
 0x1d5   :  { %297 = vst.msk [vmem:[#allocation2 + $0x8] sm:$0xff] %vm296_vm12, %v295_v51 }
 0x1dc   :  { %v299_v52 = vld [vmem:[#allocation2 + $0x8] sm:$0xff] }
 0x1dd   :  { %v301_v53 = vpack.c.bf16 %v299_v52, %v299_v52 }
 0x1df   :  { %406 = vrot.lane.b32.xlu0 %v301_v53, %s997_s27  ;;  %355 = vrot.lane.b32.xlu1 %v301_v53, %s995_s22  ;;  %v309_v54 = vsel %vm88_vm5, %v301_v53, 0 }
 0x1e0   :  { %898 = vmatpush3.bf16.msra.mxu0 %v309_v54 }
 0x1e1   :  { %909 = vmatprep.subr.bf16.mxu0 %v992_v1 }
 0x1e3   :  { %81 = vperm.xlu0 %965, %v78_v55   ;;  %900 = vmatmul.mubr.msk.bf16.vlgmr.msra.gmra.mrb[8].mxu0 %vm84_vm6, %v832_v56 }
 0x1e4   :  { %911 = vmatprep.mubr.msk.bf16.mxu0 %vm993_vm3, %v992_v1  ;;  %458 = vperm.xlu1 %966, %v455_v57  }
 0x1e8   :  { %522 = vrot.lane.b32.xlu1 %v994_v3, %s998_s19 }
 0x251   :  { %v407_v59 = vpop.permute.xlu0 %406  ;;  %v356_v60 = vpop.permute.xlu1 %355 }
 0x252   :  { %v412_v61 = vsel %vm88_vm5, %v407_v59, 0  ;;  %v357_v62 = vsel %vm186_vm7, %v354_v58, %v356_v60  ;;  %v792_v60 = vld [vmem:[%s1260_s10] sm:$0xff] }
 0x253   :  { %v362_v63 = vsel %vm88_vm5, %v357_v62, 0  ;;  %910 = vmatpush3.bf16.msra.mxu0 %v412_v61 }
 0x254   :  { %904 = vmatpush3.bf16.msra.mxu1 %v362_v63  ;;  %921 = vmatprep.subr.bf16.mxu0 %v992_v1 }
 0x255   :  { %915 = vmatprep.subr.bf16.mxu1 %v992_v1 }
 0x256   :  { %912 = vmatmul.mubr.msk.bf16.vlgmr.msra.gmra.mrb[12].mxu0 %vm84_vm6, %v835_v0 }
 0x257   :  { %906 = vmatmul.mubr.msk.bf16.vlgmr.msra.gmra.mrb[8].mxu1 %vm84_vm6, %v302_v2  ;;  %923 = vmatprep.mubr.msk.bf16.mxu0 %vm993_vm3, %v992_v1 }
 0x258   :  { %917 = vmatprep.mubr.msk.bf16.mxu1 %vm993_vm3, %v992_v1 }
 0x262   :  { %v82_v19 = vpop.permute.xlu0 %81 }
 0x263   :  { %v459_v9 = vpop.permute.xlu1 %458  ;;  %v127_v22 = vadd.f32 %v1120_v20, %v82_v19 }
 0x267   :  { %v523_v31 = vpop.permute.xlu1 %522 }
 0x2b6   :  { %v345_v4 = vpop.f32.mrb[8].mxu0 }
 0x2b7   :  { %v901_v5 = vpop.f32.mrb[9].mxu0 }
 0x2b8   :  { %v348_v6 = vpop.f32.mrb[10].mxu0  ;;  %v845_v5 = vld [vmem:[%s1259_s9 + $0x8] sm:$0xf] }
 0x2b9   :  { %v902_v7 = vpop.f32.mrb[11].mxu0  ;;  %v639_v6 = vld [vmem:[%s1259_s9] sm:$0xf]  ;;  %s1000_s9 = smov 110  }
 0x329   :  { %v448_v8 = vpop.f32.mrb[12].mxu0 }
 0x32a   :  { %v398_v10 = vpop.f32.mrb[8].mxu1  ;;  %v913_v11 = vpop.f32.mrb[13].mxu0 }
 0x32b   :  { %v399_v12 = vadd.f32 %v398_v10, %v345_v4  ;;  %v907_v13 = vpop.f32.mrb[9].mxu1  ;;  %v451_v14 = vpop.f32.mrb[14].mxu0 }
 0x32c   :  { %v401_v15 = vpop.f32.mrb[10].mxu1  ;;  %v914_v16 = vpop.f32.mrb[15].mxu0 }
 0x32d   :  { %v908_v17 = vpop.f32.mrb[11].mxu1  ;;  %v454_v18 = vadd.f32 %v448_v8, %v399_v12 }
 0x32f   :  { %v461_v21 = vadd.f32 %v459_v9, %v454_v18 }
 0x331   :  { %v462_v23 = vmax.f32 %v461_v21, 0.0 }
 0x333   :  { %v463_v24 = vadd.f32 %v462_v23, %v127_v22 }
 0x335   :  { %v464_v25 = vmax.f32 %v463_v24, 0.0 }
 0x337   :  { %v465_v26 = vsel %vm1126_vm11, %v464_v25, 0.0 }
 0x338   :  { %466 = vst.msk [vmem:[#allocation2 + $0x8] sm:$0xff] %vm296_vm12, %v465_v26 }
 0x33f   :  { %v1172_v27 = vld [vmem:[#allocation2 + $0x8] sm:$0xff] }
 0x340   :  { %v470_v28 = vpack.c.bf16 %v1172_v27, %v1172_v27 }
 0x342   :  { %576 = vrot.lane.b32.xlu1 %v470_v28, %s999_s3  ;;  %524 = vrot.lane.b32.xlu0 %v470_v28, %s998_s19  ;;  %v478_v20 = vsel %vm88_vm5, %v470_v28, 0 }
 0x343   :  { %916 = vmatpush3.bf16.msra.mxu1 %v478_v20 }
 0x344   :  { %927 = vmatprep.subr.bf16.mxu1 %v992_v1 }
 0x346   :  { %628 = vperm.xlu0 %965, %v625_v29   ;;  %918 = vmatmul.mubr.msk.bf16.vlgmr.msra.gmra.mrb[12].mxu1 %vm84_vm6, %v837_v30 }
 0x347   :  { %929 = vmatprep.mubr.msk.bf16.mxu1 %vm993_vm3, %v992_v1  ;;  %690 = vrot.lane.b32.xlu1 %v994_v3, %s998_s19  ;;  %v471_v3 = vld [vmem:[%s1257_s7] sm:$0xf] }
 0x3b4   :  { %v577_v32 = vpop.permute.xlu1 %576  ;;  %v525_v33 = vpop.permute.xlu0 %524 }
 0x3b5   :  { %v582_v34 = vsel %vm88_vm5, %v577_v32, 0  ;;  %v527_v35 = vsel %vm526_vm13, %v523_v31, %v525_v33 }
 0x3b6   :  { %v532_v36 = vsel %vm88_vm5, %v527_v35, 0  ;;  %928 = vmatpush3.bf16.msra.mxu1 %v582_v34 }
 0x3b7   :  { %922 = vmatpush3.bf16.msra.mxu0 %v532_v36  ;;  %939 = vmatprep.subr.bf16.mxu1 %v992_v1 }
 0x3b8   :  { %933 = vmatprep.subr.bf16.mxu0 %v992_v1 }
 0x3b9   :  { %930 = vmatmul.mubr.msk.bf16.vlgmr.msra.gmra.mrb[16].mxu1 %vm84_vm6, %v840_v37  ;;  %v691_v61 = vpop.permute.xlu1 %690 }
 0x3ba   :  { %924 = vmatmul.mubr.msk.bf16.vlgmr.msra.gmra.mrb[16].mxu0 %vm84_vm6, %v471_v3  ;;  %941 = vmatprep.mubr.msk.bf16.mxu1 %vm993_vm3, %v992_v1 }
 0x3bb   :  { %935 = vmatprep.mubr.msk.bf16.mxu0 %vm993_vm3, %v992_v1 }
 0x3c5   :  { %v629_v53 = vpop.permute.xlu0 %628 }
 0x419   :  { %v514_v38 = vpop.f32.mrb[12].mxu1 }
 0x41a   :  { %v919_v39 = vpop.f32.mrb[13].mxu1 }
 0x41b   :  { %v517_v40 = vpop.f32.mrb[14].mxu1 }
 0x41c   :  { %v920_v41 = vpop.f32.mrb[15].mxu1 }
 0x48c   :  { %v618_v42 = vpop.f32.mrb[16].mxu1 }
 0x48d   :  { %v568_v43 = vpop.f32.mrb[16].mxu0  ;;  %v931_v44 = vpop.f32.mrb[17].mxu1 }
 0x48e   :  { %v569_v45 = vadd.f32 %v568_v43, %v514_v38  ;;  %v925_v46 = vpop.f32.mrb[17].mxu0  ;;  %v621_v47 = vpop.f32.mrb[18].mxu1 }
 0x48f   :  { %v571_v48 = vpop.f32.mrb[18].mxu0  ;;  %v932_v50 = vpop.f32.mrb[19].mxu1 }
 0x490   :  { %v624_v51 = vadd.f32 %v618_v42, %v569_v45  ;;  %v926_v52 = vpop.f32.mrb[19].mxu0 }
 0x492   :  { %v631_v54 = vadd.f32 %v629_v53, %v624_v51 }
 0x494   :  { %v632_v55 = vmax.f32 %v631_v54, 0.0 }
 0x496   :  { %v633_v56 = vsel %vm1126_vm11, %v632_v55, 0.0 }
 0x497   :  { %634 = vst.msk [vmem:[#allocation2 + $0x8] sm:$0xff] %vm296_vm12, %v633_v56 }
 0x49e   :  { %v636_v57 = vld [vmem:[#allocation2 + $0x8] sm:$0xff] }
 0x49f   :  { %v638_v58 = vpack.c.bf16 %v636_v57, %v636_v57 }
 0x4a1   :  { %743 = vrot.lane.b32.xlu1 %v638_v58, %s999_s3  ;;  %692 = vrot.lane.b32.xlu0 %v638_v58, %s998_s19  ;;  %v646_v59 = vsel %vm88_vm5, %v638_v58, 0 }
 0x4a2   :  { %934 = vmatpush3.bf16.msra.mxu0 %v646_v59 }
 0x4a3   :  { %945 = vmatprep.subr.bf16.mxu0 %v992_v1 }
 0x4a5   :  { %795 = vperm.xlu0 %965, %v792_v60   ;;  %936 = vmatmul.mubr.msk.bf16.vlgmr.msra.gmra.mrb[20].mxu0 %vm84_vm6, %v842_v49 }
 0x4a6   :  { %947 = vmatprep.mubr.msk.bf16.mxu0 %vm993_vm3, %v992_v1 }
 0x513   :  { %v744_v62 = vpop.permute.xlu1 %743  ;;  %v693_v63 = vpop.permute.xlu0 %692 }
 0x514   :  { %v749_v0 = vsel %vm88_vm5, %v744_v62, 0  ;;  %v694_v2 = vsel %vm526_vm13, %v691_v61, %v693_v63 }
 0x515   :  { %v699_v4 = vsel %vm88_vm5, %v694_v2, 0  ;;  %946 = vmatpush3.bf16.msra.mxu0 %v749_v0 }
 0x516   :  { %940 = vmatpush3.bf16.msra.mxu1 %v699_v4 }
 0x518   :  { %948 = vmatmul.mubr.msk.bf16.vlgmr.msra.gmra.mrb[24].mxu0 %vm84_vm6, %v845_v5 }
 0x519   :  { %942 = vmatmul.mubr.msk.bf16.vlgmr.msra.gmra.mrb[20].mxu1 %vm84_vm6, %v639_v6 }
 0x524   :  { %v796_v21 = vpop.permute.xlu0 %795 }
 0x578   :  { %v682_v1 = vpop.f32.mrb[20].mxu0 }
 0x579   :  { %v937_v7 = vpop.f32.mrb[21].mxu0 }
 0x57a   :  { %v685_v8 = vpop.f32.mrb[22].mxu0 }
 0x57b   :  { %v938_v9 = vpop.f32.mrb[23].mxu0 }
 0x5eb   :  { %v785_v10 = vpop.f32.mrb[24].mxu0 }
 0x5ec   :  { %v735_v11 = vpop.f32.mrb[20].mxu1  ;;  %v949_v12 = vpop.f32.mrb[25].mxu0 }
 0x5ed   :  { %v736_v13 = vadd.f32 %v735_v11, %v682_v1  ;;  %v943_v14 = vpop.f32.mrb[21].mxu1  ;;  %v788_v15 = vpop.f32.mrb[26].mxu0 }
 0x5ee   :  { %v738_v16 = vpop.f32.mrb[22].mxu1  ;;  %v950_v17 = vpop.f32.mrb[27].mxu0 }
 0x5ef   :  { %v791_v18 = vadd.f32 %v785_v10, %v736_v13  ;;  %v944_v19 = vpop.f32.mrb[23].mxu1 }
 0x5f1   :  { %v798_v22 = vadd.f32 %v796_v21, %v791_v18 }
 0x5f3   :  { %v799_v23 = vmax.f32 %v798_v22, 0.0 }
 0x5f5   :  { %v800_v24 = vadd.f32 %v799_v23, %v1172_v27 }
 0x5f7   :  { %v801_v25 = vmax.f32 %v800_v24, 0.0 }
 0x5f9   :  { %804 = vrot.lane.b32.xlu1 %v801_v25, %s1000_s9  ;;  %802 = vst.msk [vmem:[#allocation3] sm:$0xff] %vm46_vm2, %v801_v25 }
 0x66b   :  { %v805_v26 = vpop.permute.xlu1 %804 }
 0x66c   :  { %808 = vst.msk [vmem:[#allocation3 + $0x8] sm:$0xff] %vm46_vm2, %v805_v26 }
 0x66d   :  { %978 = shalt.err (!%p975_p4)
}
 0x66e   :  { %s979_s15 = scalar_lea.hbm %s1261_s11, 256 }
 0x66f   :  { %p980_p5 = scmp.ne.s32.totalorder %s1261_s11, %s979_s15  ;;  %p983_p6 = scmp.lt.u32.totalorder %s979_s15, %s1261_s11 }
 0x671   :  { %p985_p7 = pnand %p983_p6, %p980_p5 }
 0x673   :  { %988 = shalt.err (!%p985_p7)
}
 0x674   :  { %s1002_s18 = smov 128   ;;  %s1003_s19 = smov 8  }
 0x675   :  { %820 = dma.vmem_to_hbm [thread:$0]  %s815_s1, 256, %s1261_s11, [#allocation4], %s1002_s18, %s1002_s18, %s1003_s19  }
 0x676   :  { %989 = dma.done.wait [#allocation4], 256  }
 0x677   :  { %990 = vsyncadd [#allocation4], 4294967040 }
 0x678   :  { %824 = vsyncpa [#allocation4], 1 }

</bundles_post_ra>
